<compile_context>
chip_gen: v6e
topology: v6e:2x2x1
jax: 0.10.0
libtpu: 0.0.40
codegen_flags: <defaults>
</compile_context>

<pallas_src>
import functools

import jax
import jax.numpy as jnp
from jax.experimental import pallas as pl
from jax.experimental.pallas import tpu as pltpu

LANE = 128   # TPU vreg lane width
SUB = 8      # TPU vreg sublane count


def _round_up(n, m):
    return ((n + m - 1) // m) * m


def _sigmoid(z):
    # Exact sigmoid via one EUP tanh per element: sigmoid(z) = 0.5*tanh(z/2) + 0.5
    return 0.5 * jnp.tanh(0.5 * z) + 0.5


def _disc_kernel(x_ref, p_ref, out_ref):
    """One batch tile.

    x_ref:   (32, L) f32 in VMEM. Feature k occupies sublane rows [8k, 8k+8);
             element (8k+s, c) is feature k of batch element b = s*C + col,
             where col is the global column this tile covers.
    p_ref:   (19,) f32 in SMEM:
               [0:12]  w1 (in,out) row-major  -> w1[k,j] at 3*k + j
               [12:15] b1
               [15:18] w2
               [18]    b2
    out_ref: (8, L) f32 in VMEM; out[s, c] = discriminator output for the same
             batch element mapping as x_ref.
    """
    L = x_ref.shape[1]
    acc = jnp.full((SUB, L), p_ref[18], dtype=jnp.float32)      # + b2
    for j in range(3):                                           # hidden units
        z = jnp.full((SUB, L), p_ref[12 + j], dtype=jnp.float32)  # + b1[j]
        for k in range(4):                                       # input features
            z = z + p_ref[3 * k + j] * x_ref[SUB * k:SUB * (k + 1), :]
        acc = acc + p_ref[15 + j] * _sigmoid(z)
    out_ref[...] = _sigmoid(acc)                                 # lane-dense store


@functools.partial(jax.jit, static_argnames=("block_cols",))
def discriminator_forward(x, w1, b1, w2, b2, *, block_cols=32768):
    """x: (B, 4) float32 -> (B, 1) float32 (matches the PyTorch module forward).

    Weights use the (in, out) convention: w1 (4,3), b1 (1,3) or (3,), w2 (3,1),
    b2 (1,1) or (1,), i.e. y = sigmoid(sigmoid(x @ w1 + b1) @ w2 + b2).
    """
    B = x.shape[0]
    assert x.shape[1] == 4, "Discriminator expects 4 input features"

    # Defensive rounding of the caller-supplied tile width (lane multiple).
    block_cols = max(LANE, _round_up(int(block_cols), LANE))

    # Columns of the (8-sublane, C-lane) batch plane; multiple of 128.
    C = _round_up(pl.cdiv(B, SUB), LANE)
    # Number of grid steps: enough to respect block_cols, and >=2 whenever there
    # is more than one lane-tile of work (so v7x can use both TensorCores).
    T = pl.cdiv(C, block_cols)
    if C >= 2 * LANE:
        T = max(T, 2)
    Lc = _round_up(pl.cdiv(C, T), LANE)   # tile width in columns (multiple of 128)
    Cp = T * Lc                           # padded column count (tiles divide evenly)
    Bp = SUB * Cp                         # padded batch size

    # Relayout: (B,4) -> feature-major (4,Bp) -> (32,Cp); feature k in rows
    # [8k, 8k+8), batch element b at (8k + b // Cp, b % Cp). One XLA copy pass.
    xt = jnp.transpose(x.astype(jnp.float32))            # (4, B)
    xt = jnp.pad(xt, ((0, 0), (0, Bp - B)))              # (4, Bp), zero tail
    xr = xt.reshape(32, Cp)                              # free reshape

    # Pack the 19 scalars into one flat f32 SMEM array.
    params = jnp.concatenate([
        jnp.asarray(w1, jnp.float32).reshape(-1),        # (12,) w1[k*3+j]
        jnp.asarray(b1, jnp.float32).reshape(-1),        # (3,)
        jnp.asarray(w2, jnp.float32).reshape(-1),        # (3,)
        jnp.asarray(b2, jnp.float32).reshape(-1),        # (1,)
    ])

    out = pl.pallas_call(
        _disc_kernel,
        out_shape=jax.ShapeDtypeStruct((SUB, Cp), jnp.float32),
        grid=(T,),
        in_specs=[
            # (32, Lc): sublane dim equals the full array dim (32), lane dim is a
            # multiple of 128 -> valid, unpadded TPU block.
            pl.BlockSpec((32, Lc), lambda i: (0, i)),
            pl.BlockSpec(memory_space=pltpu.MemorySpace.SMEM),
        ],
        out_specs=pl.BlockSpec((SUB, Lc), lambda i: (0, i)),
        compiler_params=pltpu.CompilerParams(
            dimension_semantics=("parallel",),     # batch tiles are independent
            vmem_limit_bytes=32 * 1024 * 1024,     # fits v5e; <= default elsewhere
        ),
    )(xr, params)

    # (8, Cp) -> flat batch order -> (B, 1). Padding rows/cols are sliced away.
    return out.reshape(-1)[:B].reshape(B, 1)


def init_params(key):
    """Deterministic init mimicking PyTorch's default Linear init
    (uniform in +-1/sqrt(fan_in)). Weights stored as (in, out)."""
    k1, k2, k3, k4 = jax.random.split(key, 4)
    bound1 = 1.0 / jnp.sqrt(4.0)
    bound2 = 1.0 / jnp.sqrt(3.0)
    w1 = jax.random.uniform(k1, (4, 3), jnp.float32, -bound1, bound1)
    b1 = jax.random.uniform(k2, (1, 3), jnp.float32, -bound1, bound1)
    w2 = jax.random.uniform(k3, (3, 1), jnp.float32, -bound2, bound2)
    b2 = jax.random.uniform(k4, (1, 1), jnp.float32, -bound2, bound2)
    return w1, b1, w2, b2


def _reference(x, w1, b1, w2, b2):
    return jax.nn.sigmoid(jax.nn.sigmoid(x @ w1 + b1) @ w2 + b2)


# TODO(synk): training-side pieces of the module (MSELoss, Adam, progress
# tracking, plot_progress) are host/optimizer logic, not a forward-pass kernel.

if __name__ == "__main__":
    key = jax.random.PRNGKey(0)
    k_x, k_x2, k_p = jax.random.split(key, 3)
    w1, b1, w2, b2 = init_params(k_p)

    # Small batch (single tile, grid of 1).
    B = 8
    x = jax.random.normal(k_x, (B, 4), jnp.float32)
    out = jax.block_until_ready(discriminator_forward(x, w1, b1, w2, b2))
    ref = _reference(x, w1, b1, w2, b2)
    assert out.shape == (B, 1)
    assert jnp.allclose(out, ref, atol=1e-3, rtol=1e-3)

    # Larger, non-aligned batch with a small tile to exercise a multi-step grid
    # (2 tiles of 128 columns) and the padding / slicing path.
    B2 = 1200
    x2 = jax.random.normal(k_x2, (B2, 4), jnp.float32)
    out2 = jax.block_until_ready(
        discriminator_forward(x2, w1, b1, w2, b2, block_cols=128)
    )
    ref2 = _reference(x2, w1, b1, w2, b2)
    assert out2.shape == (B2, 1)
    assert jnp.allclose(out2, ref2, atol=1e-3, rtol=1e-3)

    print("KERNEL_OK")
</pallas_src>

<mosaic_0001>
module attributes {stable_mosaic.version = 11 : i64} {
  func.func @_disc_kernel(%arg0: i32, %arg1: memref<32x128xf32, #tpu.memory_space<vmem>>, %arg2: memref<19xf32, #tpu.memory_space<smem>>, %arg3: memref<8x128xf32, #tpu.memory_space<vmem>>) attributes {dimension_semantics = [#tpu.dimension_semantics<parallel>], iteration_bounds = array<i64: 1>, scalar_prefetch = 0 : i64, scratch_operands = 0 : i64, tpu.core_type = #tpu.core_type<tc>, window_params = [{transform_indices = @transform_0, window_bounds = array<i64: 32, 128>}, {transform_indices = @transform_1, window_bounds = array<i64: 19>}, {transform_indices = @transform_2, window_bounds = array<i64: 8, 128>}]} {
    %c18 = arith.constant 18 : index
    %0 = memref.load %arg2[%c18] : memref<19xf32, #tpu.memory_space<smem>>
    %1 = vector.broadcast %0 : f32 to vector<8x128xf32>
    %c12 = arith.constant 12 : index
    %2 = memref.load %arg2[%c12] : memref<19xf32, #tpu.memory_space<smem>>
    %3 = vector.broadcast %2 : f32 to vector<8x128xf32>
    %c0 = arith.constant 0 : index
    %4 = memref.load %arg2[%c0] : memref<19xf32, #tpu.memory_space<smem>>
    %c0_0 = arith.constant 0 : index
    %c0_1 = arith.constant 0 : index
    %5 = vector.load %arg1[%c0_0, %c0_1] : memref<32x128xf32, #tpu.memory_space<vmem>>, vector<8x128xf32>
    %6 = vector.broadcast %4 : f32 to vector<8x128xf32>
    %7 = arith.mulf %6, %5 : vector<8x128xf32>
    %8 = arith.addf %3, %7 : vector<8x128xf32>
    %c3 = arith.constant 3 : index
    %9 = memref.load %arg2[%c3] : memref<19xf32, #tpu.memory_space<smem>>
    %c8 = arith.constant 8 : index
    %c0_2 = arith.constant 0 : index
    %10 = vector.load %arg1[%c8, %c0_2] : memref<32x128xf32, #tpu.memory_space<vmem>>, vector<8x128xf32>
    %11 = vector.broadcast %9 : f32 to vector<8x128xf32>
    %12 = arith.mulf %11, %10 : vector<8x128xf32>
    %13 = arith.addf %8, %12 : vector<8x128xf32>
    %c6 = arith.constant 6 : index
    %14 = memref.load %arg2[%c6] : memref<19xf32, #tpu.memory_space<smem>>
    %c16 = arith.constant 16 : index
    %c0_3 = arith.constant 0 : index
    %15 = vector.load %arg1[%c16, %c0_3] : memref<32x128xf32, #tpu.memory_space<vmem>>, vector<8x128xf32>
    %16 = vector.broadcast %14 : f32 to vector<8x128xf32>
    %17 = arith.mulf %16, %15 : vector<8x128xf32>
    %18 = arith.addf %13, %17 : vector<8x128xf32>
    %c9 = arith.constant 9 : index
    %19 = memref.load %arg2[%c9] : memref<19xf32, #tpu.memory_space<smem>>
    %c24 = arith.constant 24 : index
    %c0_4 = arith.constant 0 : index
    %20 = vector.load %arg1[%c24, %c0_4] : memref<32x128xf32, #tpu.memory_space<vmem>>, vector<8x128xf32>
    %21 = vector.broadcast %19 : f32 to vector<8x128xf32>
    %22 = arith.mulf %21, %20 : vector<8x128xf32>
    %23 = arith.addf %18, %22 : vector<8x128xf32>
    %c15 = arith.constant 15 : index
    %24 = memref.load %arg2[%c15] : memref<19xf32, #tpu.memory_space<smem>>
    %cst = arith.constant 5.000000e-01 : f32
    %25 = vector.broadcast %cst : f32 to vector<8x128xf32>
    %26 = arith.mulf %25, %23 : vector<8x128xf32>
    %27 = math.tanh %26 : vector<8x128xf32>
    %cst_5 = arith.constant 5.000000e-01 : f32
    %28 = vector.broadcast %cst_5 : f32 to vector<8x128xf32>
    %29 = arith.mulf %28, %27 : vector<8x128xf32>
    %cst_6 = arith.constant 5.000000e-01 : f32
    %30 = vector.broadcast %cst_6 : f32 to vector<8x128xf32>
    %31 = arith.addf %29, %30 : vector<8x128xf32>
    %32 = vector.broadcast %24 : f32 to vector<8x128xf32>
    %33 = arith.mulf %32, %31 : vector<8x128xf32>
    %34 = arith.addf %1, %33 : vector<8x128xf32>
    %c13 = arith.constant 13 : index
    %35 = memref.load %arg2[%c13] : memref<19xf32, #tpu.memory_space<smem>>
    %36 = vector.broadcast %35 : f32 to vector<8x128xf32>
    %c1 = arith.constant 1 : index
    %37 = memref.load %arg2[%c1] : memref<19xf32, #tpu.memory_space<smem>>
    %c0_7 = arith.constant 0 : index
    %c0_8 = arith.constant 0 : index
    %38 = vector.load %arg1[%c0_7, %c0_8] : memref<32x128xf32, #tpu.memory_space<vmem>>, vector<8x128xf32>
    %39 = vector.broadcast %37 : f32 to vector<8x128xf32>
    %40 = arith.mulf %39, %38 : vector<8x128xf32>
    %41 = arith.addf %36, %40 : vector<8x128xf32>
    %c4 = arith.constant 4 : index
    %42 = memref.load %arg2[%c4] : memref<19xf32, #tpu.memory_space<smem>>
    %c8_9 = arith.constant 8 : index
    %c0_10 = arith.constant 0 : index
    %43 = vector.load %arg1[%c8_9, %c0_10] : memref<32x128xf32, #tpu.memory_space<vmem>>, vector<8x128xf32>
    %44 = vector.broadcast %42 : f32 to vector<8x128xf32>
    %45 = arith.mulf %44, %43 : vector<8x128xf32>
    %46 = arith.addf %41, %45 : vector<8x128xf32>
    %c7 = arith.constant 7 : index
    %47 = memref.load %arg2[%c7] : memref<19xf32, #tpu.memory_space<smem>>
    %c16_11 = arith.constant 16 : index
    %c0_12 = arith.constant 0 : index
    %48 = vector.load %arg1[%c16_11, %c0_12] : memref<32x128xf32, #tpu.memory_space<vmem>>, vector<8x128xf32>
    %49 = vector.broadcast %47 : f32 to vector<8x128xf32>
    %50 = arith.mulf %49, %48 : vector<8x128xf32>
    %51 = arith.addf %46, %50 : vector<8x128xf32>
    %c10 = arith.constant 10 : index
    %52 = memref.load %arg2[%c10] : memref<19xf32, #tpu.memory_space<smem>>
    %c24_13 = arith.constant 24 : index
    %c0_14 = arith.constant 0 : index
    %53 = vector.load %arg1[%c24_13, %c0_14] : memref<32x128xf32, #tpu.memory_space<vmem>>, vector<8x128xf32>
    %54 = vector.broadcast %52 : f32 to vector<8x128xf32>
    %55 = arith.mulf %54, %53 : vector<8x128xf32>
    %56 = arith.addf %51, %55 : vector<8x128xf32>
    %c16_15 = arith.constant 16 : index
    %57 = memref.load %arg2[%c16_15] : memref<19xf32, #tpu.memory_space<smem>>
    %cst_16 = arith.constant 5.000000e-01 : f32
    %58 = vector.broadcast %cst_16 : f32 to vector<8x128xf32>
    %59 = arith.mulf %58, %56 : vector<8x128xf32>
    %60 = math.tanh %59 : vector<8x128xf32>
    %cst_17 = arith.constant 5.000000e-01 : f32
    %61 = vector.broadcast %cst_17 : f32 to vector<8x128xf32>
    %62 = arith.mulf %61, %60 : vector<8x128xf32>
    %cst_18 = arith.constant 5.000000e-01 : f32
    %63 = vector.broadcast %cst_18 : f32 to vector<8x128xf32>
    %64 = arith.addf %62, %63 : vector<8x128xf32>
    %65 = vector.broadcast %57 : f32 to vector<8x128xf32>
    %66 = arith.mulf %65, %64 : vector<8x128xf32>
    %67 = arith.addf %34, %66 : vector<8x128xf32>
    %c14 = arith.constant 14 : index
    %68 = memref.load %arg2[%c14] : memref<19xf32, #tpu.memory_space<smem>>
    %69 = vector.broadcast %68 : f32 to vector<8x128xf32>
    %c2 = arith.constant 2 : index
    %70 = memref.load %arg2[%c2] : memref<19xf32, #tpu.memory_space<smem>>
    %c0_19 = arith.constant 0 : index
    %c0_20 = arith.constant 0 : index
    %71 = vector.load %arg1[%c0_19, %c0_20] : memref<32x128xf32, #tpu.memory_space<vmem>>, vector<8x128xf32>
    %72 = vector.broadcast %70 : f32 to vector<8x128xf32>
    %73 = arith.mulf %72, %71 : vector<8x128xf32>
    %74 = arith.addf %69, %73 : vector<8x128xf32>
    %c5 = arith.constant 5 : index
    %75 = memref.load %arg2[%c5] : memref<19xf32, #tpu.memory_space<smem>>
    %c8_21 = arith.constant 8 : index
    %c0_22 = arith.constant 0 : index
    %76 = vector.load %arg1[%c8_21, %c0_22] : memref<32x128xf32, #tpu.memory_space<vmem>>, vector<8x128xf32>
    %77 = vector.broadcast %75 : f32 to vector<8x128xf32>
    %78 = arith.mulf %77, %76 : vector<8x128xf32>
    %79 = arith.addf %74, %78 : vector<8x128xf32>
    %c8_23 = arith.constant 8 : index
    %80 = memref.load %arg2[%c8_23] : memref<19xf32, #tpu.memory_space<smem>>
    %c16_24 = arith.constant 16 : index
    %c0_25 = arith.constant 0 : index
    %81 = vector.load %arg1[%c16_24, %c0_25] : memref<32x128xf32, #tpu.memory_space<vmem>>, vector<8x128xf32>
    %82 = vector.broadcast %80 : f32 to vector<8x128xf32>
    %83 = arith.mulf %82, %81 : vector<8x128xf32>
    %84 = arith.addf %79, %83 : vector<8x128xf32>
    %c11 = arith.constant 11 : index
    %85 = memref.load %arg2[%c11] : memref<19xf32, #tpu.memory_space<smem>>
    %c24_26 = arith.constant 24 : index
    %c0_27 = arith.constant 0 : index
    %86 = vector.load %arg1[%c24_26, %c0_27] : memref<32x128xf32, #tpu.memory_space<vmem>>, vector<8x128xf32>
    %87 = vector.broadcast %85 : f32 to vector<8x128xf32>
    %88 = arith.mulf %87, %86 : vector<8x128xf32>
    %89 = arith.addf %84, %88 : vector<8x128xf32>
    %c17 = arith.constant 17 : index
    %90 = memref.load %arg2[%c17] : memref<19xf32, #tpu.memory_space<smem>>
    %cst_28 = arith.constant 5.000000e-01 : f32
    %91 = vector.broadcast %cst_28 : f32 to vector<8x128xf32>
    %92 = arith.mulf %91, %89 : vector<8x128xf32>
    %93 = math.tanh %92 : vector<8x128xf32>
    %cst_29 = arith.constant 5.000000e-01 : f32
    %94 = vector.broadcast %cst_29 : f32 to vector<8x128xf32>
    %95 = arith.mulf %94, %93 : vector<8x128xf32>
    %cst_30 = arith.constant 5.000000e-01 : f32
    %96 = vector.broadcast %cst_30 : f32 to vector<8x128xf32>
    %97 = arith.addf %95, %96 : vector<8x128xf32>
    %98 = vector.broadcast %90 : f32 to vector<8x128xf32>
    %99 = arith.mulf %98, %97 : vector<8x128xf32>
    %100 = arith.addf %67, %99 : vector<8x128xf32>
    %cst_31 = arith.constant 5.000000e-01 : f32
    %101 = vector.broadcast %cst_31 : f32 to vector<8x128xf32>
    %102 = arith.mulf %101, %100 : vector<8x128xf32>
    %103 = math.tanh %102 : vector<8x128xf32>
    %cst_32 = arith.constant 5.000000e-01 : f32
    %104 = vector.broadcast %cst_32 : f32 to vector<8x128xf32>
    %105 = arith.mulf %104, %103 : vector<8x128xf32>
    %cst_33 = arith.constant 5.000000e-01 : f32
    %106 = vector.broadcast %cst_33 : f32 to vector<8x128xf32>
    %107 = arith.addf %105, %106 : vector<8x128xf32>
    %c0_34 = arith.constant 0 : index
    %c0_35 = arith.constant 0 : index
    %108 = vector.load %arg3[%c0_34, %c0_35] : memref<8x128xf32, #tpu.memory_space<vmem>>, vector<8x128xf32>
    tpu.vector_store %arg3[%c0_34, %c0_35], %107 {strides = array<i32>} : memref<8x128xf32, #tpu.memory_space<vmem>>, vector<8x128xf32>,
    return
  }
  func.func @transform_0(%arg0: i32) -> (i32, i32) {
    %c0_i32 = arith.constant 0 : i32
    %c0_i32_0 = arith.constant 0 : i32
    return %c0_i32, %arg0 : i32, i32
  }
  func.func @transform_1(%arg0: i32) -> i32 {
    %c0_i32 = arith.constant 0 : i32
    %c0_i32_0 = arith.constant 0 : i32
    return %c0_i32 : i32
  }
  func.func @transform_2(%arg0: i32) -> (i32, i32) {
    %c0_i32 = arith.constant 0 : i32
    %c0_i32_0 = arith.constant 0 : i32
    return %c0_i32, %arg0 : i32, i32
  }
}

</mosaic_0001>

<bundles_post_ra>
// kernel: discriminator_forward.1
= control target key start
LH: loop header
LB: loop body
LE: loop exit
PB: predicated region body
PF: predicated region fallthrough
CT: control target
= control target key end

     0   :  { %7 = vsyncpa [#allocation3], 0  ;;  %s193_s0 = inlined_call_operand.vmem [shape: f32[32,128], index: 0, kind: input, shape index: {}]   ;;  %s194_s1 = inlined_call_operand.vmem [shape: f32[19], index: 1, kind: input, shape index: {}]   ;;  %s195_s2 = inlined_call_operand.vmem [shape: f32[8,128], index: 2, kind: output, shape index: {}]  }
   0x1   :  { %s16_s11 = sshll.u32 %s194_s1, 4  ;;  %s17_s11 = int_to_ptr.vmem [resolvable:$true] %s16_s11 }
   0x2   :  { %s145_s12 = scalar_lea.vmem %s17_s11, 16  ;;  %p150_p1 = scmp.lt.s32.totalorder %s17_s11, %s17_s11 }
   0x3   :  { %p146_p0 = scmp.ne.s32.totalorder %s17_s11, %s145_s12  ;;  %p151_p2 = scmp.lt.s32.totalorder %s145_s12, %s145_s12 }
   0x5   :  { %p152_p3 = por %p151_p2, %p150_p1 }
   0x7   :  { %p153_p4 = pnand %p152_p3, %p146_p0 }
   0x9   :  { %156 = shalt.err (!%p153_p4)
}
   0xa   :  { %s159_s13 = smov [#allocation2]  }
   0xb   :  { %19 = dma.vmem_to_smem %s17_s11, 16, %s159_s13, [#allocation3]  }
   0xc   :  { %157 = dma.done.wait [#allocation3], 16  }
   0xd   :  { %158 = vsyncadd [#allocation3], 4294967280 }
   0xe   :  { %23 = sfence }
   0xf   :  { %s119_s14 = sld [smem:[#allocation2 + $0xc]]  ;;  %v29_v0 = vld [vmem:[%s193_s0] sm:$0xff]  ;;  %v34_v1 = vld [vmem:[%s193_s0 + $0x8] sm:$0xff]  ;;  %v39_v4 = vld [vmem:[%s193_s0 + $0x10] sm:$0xff] }
  0x10   :  { %s28_s15 = sld [smem:[#allocation2]]  ;;  %v44_v9 = vld [vmem:[%s193_s0 + $0x18] sm:$0xff] }
  0x11   :  { %s120_s16 = sld [smem:[#allocation2 + $0x3]] }
  0x12   :  { %s121_s17 = sld [smem:[#allocation2 + $0x6]] }
  0x13   :  { %s122_s18 = sld [smem:[#allocation2 + $0x9]] }
  0x14   :  { %s124_s22 = sld [smem:[#allocation2 + $0xd]] }
  0x15   :  { %v27_v2 = vstv %s119_s14  ;;  %s125_s25 = sld [smem:[#allocation2 + $0x1]] }
  0x16   :  { %v30_v3 = vstv %s28_s15  ;;  %s126_s26 = sld [smem:[#allocation2 + $0x4]] }
  0x17   :  { %v31_v5 = vmul.f32 %v30_v3, %v29_v0  ;;  %v35_v6 = vstv %s120_s16  ;;  %s127_s29 = sld [smem:[#allocation2 + $0x7]] }
  0x18   :  { %v36_v7 = vmul.f32 %v35_v6, %v34_v1  ;;  %v40_v8 = vstv %s121_s17  ;;  %s128_s30 = sld [smem:[#allocation2 + $0xa]] }
  0x19   :  { %v32_v10 = vadd.f32 %v31_v5, %v27_v2  ;;  %v41_v11 = vmul.f32 %v40_v8, %v39_v4  ;;  %v45_v12 = vstv %s122_s18  ;;  %s130_s3 = sld [smem:[#allocation2 + $0xe]] }
  0x1a   :  { %v46_v14 = vmul.f32 %v45_v12, %v44_v9  ;;  %v57_v15 = vstv %s124_s22  ;;  %s131_s4 = sld [smem:[#allocation2 + $0x2]] }
  0x1b   :  { %v37_v13 = vadd.f32 %v36_v7, %v32_v10  ;;  %v59_v16 = vstv %s125_s25  ;;  %s132_s5 = sld [smem:[#allocation2 + $0x5]] }
  0x1c   :  { %v60_v18 = vmul.f32 %v59_v16, %v29_v0  ;;  %v63_v19 = vstv %s126_s26  ;;  %s133_s6 = sld [smem:[#allocation2 + $0x8]] }
  0x1d   :  { %v42_v17 = vadd.f32 %v41_v11, %v37_v13  ;;  %v64_v20 = vmul.f32 %v63_v19, %v34_v1  ;;  %v67_v21 = vstv %s127_s29  ;;  %s134_s0 = sld [smem:[#allocation2 + $0xb]] }
  0x1e   :  { %v61_v23 = vadd.f32 %v60_v18, %v57_v15  ;;  %v68_v24 = vmul.f32 %v67_v21, %v39_v4  ;;  %v71_v25 = vstv %s128_s30  ;;  %s123_s7 = sld [smem:[#allocation2 + $0xf]] }
  0x1f   :  { %v47_v22 = vadd.f32 %v46_v14, %v42_v17  ;;  %v72_v28 = vmul.f32 %v71_v25, %v44_v9  ;;  %v83_v29 = vstv %s130_s3  ;;  %s118_s8 = sld [smem:[#allocation2 + $0x12]] }
  0x20   :  { %v65_v27 = vadd.f32 %v64_v20, %v61_v23  ;;  %v85_v30 = vstv %s131_s4  ;;  %s129_s9 = sld [smem:[#allocation2 + $0x10]] }
  0x21   :  { %v49_v26 = vmul.f32 0.5, %v47_v22  ;;  %v86_v32 = vmul.f32 %v85_v30, %v29_v0  ;;  %v89_v33 = vstv %s132_s5  ;;  %s135_s10 = sld [smem:[#allocation2 + $0x11]] }
  0x22   :  { %v69_v31 = vadd.f32 %v68_v24, %v65_v27  ;;  %v90_v34 = vmul.f32 %v89_v33, %v34_v1  ;;  %v93_v35 = vstv %s133_s6 }
  0x23   :  { %137 = vtanh.f32 %v49_v26  ;;  %v87_v37 = vadd.f32 %v86_v32, %v83_v29  ;;  %v94_v38 = vmul.f32 %v93_v35, %v39_v4  ;;  %v97_v39 = vstv %s134_s0 }
  0x24   :  { %v73_v36 = vadd.f32 %v72_v28, %v69_v31  ;;  %v98_v42 = vmul.f32 %v97_v39, %v44_v9  ;;  %v53_v49 = vstv %s123_s7 }
  0x25   :  { %v91_v41 = vadd.f32 %v90_v34, %v87_v37  ;;  %v25_v53 = vstv %s118_s8 }
  0x26   :  { %v75_v40 = vmul.f32 0.5, %v73_v36  ;;  %v79_v54 = vstv %s129_s9 }
  0x27   :  { %v95_v43 = vadd.f32 %v94_v38, %v91_v41  ;;  %v105_v60 = vstv %s135_s10 }
  0x28   :  { %139 = vtanh.f32 %v75_v40 }
  0x29   :  { %v99_v44 = vadd.f32 %v98_v42, %v95_v43 }
  0x2b   :  { %v101_v45 = vmul.f32 0.5, %v99_v44 }
  0x2d   :  { %141 = vtanh.f32 %v101_v45 }
  0x30   :  { %v138_v46 = vpop.eup %137 }
  0x31   :  { %v51_v47 = vmul.f32 0.5, %v138_v46 }
  0x33   :  { %v52_v48 = vadd.f32 0.5, %v51_v47 }
  0x35   :  { %v140_v50 = vpop.eup %139  ;;  %v54_v51 = vmul.f32 %v53_v49, %v52_v48 }
  0x36   :  { %v77_v52 = vmul.f32 0.5, %v140_v50 }
  0x37   :  { %v55_v56 = vadd.f32 %v54_v51, %v25_v53 }
  0x38   :  { %v78_v55 = vadd.f32 0.5, %v77_v52 }
  0x3a   :  { %v80_v57 = vmul.f32 %v79_v54, %v78_v55  ;;  %v142_v58 = vpop.eup %141 }
  0x3b   :  { %v103_v59 = vmul.f32 0.5, %v142_v58 }
  0x3c   :  { %v81_v61 = vadd.f32 %v80_v57, %v55_v56 }
  0x3d   :  { %v104_v62 = vadd.f32 0.5, %v103_v59 }
  0x3f   :  { %v106_v63 = vmul.f32 %v105_v60, %v104_v62 }
  0x41   :  { %v107_v0 = vadd.f32 %v106_v63, %v81_v61 }
  0x43   :  { %v108_v1 = vmul.f32 0.5, %v107_v0 }
  0x45   :  { %143 = vtanh.f32 %v108_v1 }
  0x52   :  { %v144_v2 = vpop.eup %143 }
  0x53   :  { %v110_v3 = vmul.f32 0.5, %v144_v2 }
  0x55   :  { %v111_v4 = vadd.f32 0.5, %v110_v3 }
  0x57   :  { %112 = vst [vmem:[%s195_s2] sm:$0xff] %v111_v4 }
  0x58   :  { %117 = vsyncpa [#allocation3], 1 }

</bundles_post_ra>
